<compile_context>
chip_gen: v7x
topology: tpu7x:2x2x1
jax: 0.10.0
libtpu: 0.0.40
codegen_flags: <defaults>
</compile_context>

<pallas_src>
import functools

import jax
import jax.numpy as jnp
from jax.experimental import pallas as pl
from jax.experimental.pallas import tpu as pltpu


def _gauss_norm_kernel(x_ref, w_ref, b_ref, o_ref):
    """Fused Linear for one row tile: o = x @ W + b (f32 accumulate/store)."""
    y = jnp.dot(x_ref[...], w_ref[...], preferred_element_type=jnp.float32)
    o_ref[...] = (y + b_ref[...]).astype(o_ref.dtype)


def _round_up(a, m):
    return ((a + m - 1) // m) * m


def _default_tm():
    """Per-generation default row tile (amortizes per-step overhead)."""
    try:
        kind = jax.devices()[0].device_kind.lower()
    except Exception:  # pragma: no cover - be robust on odd backends
        return 4096
    if "v5" in kind:
        return 4096      # 16 MiB scoped-VMEM default on v5e
    return 8192          # v6e / v7x


@functools.partial(jax.jit, static_argnames=("tm",))
def _gauss_norm_impl(x, w, b, *, tm):
    B, C = x.shape[0], x.shape[1]
    c_in = 1
    for d in x.shape[2:]:
        c_in *= d
    c_out = w.shape[1]
    assert w.shape[0] == c_in, "weight in-features must match prod of trailing dims"

    # Pure row-major reshape -- no transpose, no extra HBM pass.
    M = B * C
    x_flat = x.reshape(M, c_in)

    # Clamp the row tile for tiny M (keep it a multiple of 8 sublanes).
    tm = max(8, min(tm, _round_up(M, 8)))
    grid = (pl.cdiv(M, tm),)          # ragged last block handled by Pallas masking

    # Stream the dominant reads as bf16; accumulate in f32 on the MXU.
    x_bf = x_flat.astype(jnp.bfloat16)
    w_bf = w.astype(jnp.bfloat16)
    b2 = b.reshape(1, c_out).astype(jnp.float32)

    x_spec = pl.BlockSpec((tm, c_in), lambda i: (i, 0))
    w_spec = pl.BlockSpec((c_in, c_out), lambda i: (0, 0))
    b_spec = pl.BlockSpec((1, c_out), lambda i: (0, 0))
    o_spec = pl.BlockSpec((tm, c_out), lambda i: (i, 0))

    # Scoped VMEM: double-buffered x (bf16) + y (f32) tiles, plus W and bias.
    vmem_bytes = (2 * tm * c_in * 2          # x tiles, bf16, double-buffered
                  + 2 * tm * c_out * 4       # y tiles, f32, double-buffered
                  + 2 * c_in * c_out * 2     # W, bf16
                  + 2 * c_out * 4            # bias
                  + (2 << 20))               # headroom

    cost = pl.CostEstimate(
        flops=2 * M * c_in * c_out,
        transcendentals=0,
        bytes_accessed=(M * c_in * 2          # x read (bf16)
                        + c_in * c_out * 2    # W read (bf16)
                        + c_out * 4           # bias read
                        + M * c_out * 4),     # y write (f32)
    )

    y_flat = pl.pallas_call(
        _gauss_norm_kernel,
        out_shape=jax.ShapeDtypeStruct((M, c_out), jnp.float32),
        grid_spec=pltpu.PrefetchScalarGridSpec(
            num_scalar_prefetch=0,
            grid=grid,
            in_specs=[x_spec, w_spec, b_spec],
            out_specs=o_spec,
        ),
        compiler_params=pltpu.CompilerParams(
            dimension_semantics=("parallel",),
            vmem_limit_bytes=int(vmem_bytes),
        ),
        cost_estimate=cost,
    )(x_bf, w_bf, b2)

    # unsqueeze(2) is a pure reshape -- no data movement.
    return y_flat.reshape(B, C, 1, c_out)


def gauss_norm(x, w, b, *, tm=None):
    """x: (B, C, *spatial) f32.  w: (c_in, c_out), b: (c_out,).

    Returns (B, C, 1, c_out) f32, matching GaussNorm.forward.
    """
    if tm is None:
        tm = _default_tm()
    return _gauss_norm_impl(x, w, b, tm=tm)


def init_params(key, c_in, c_out):
    """Mimics nn.Linear(c_in, c_out) init; weight stored as (c_in, c_out)."""
    kw, kb = jax.random.split(key)
    bound = 1.0 / jnp.sqrt(jnp.float32(c_in))
    w = jax.random.uniform(kw, (c_in, c_out), jnp.float32, -bound, bound)
    b = jax.random.uniform(kb, (c_out,), jnp.float32, -bound, bound)
    return w, b


def _reference(x, w, b):
    """Plain-JAX replica of GaussNorm.forward."""
    B, C = x.shape[0], x.shape[1]
    x1 = x.reshape(B, C, -1)
    y = jnp.einsum("bci,io->bco", x1, w) + b[None, None, :]
    return y[:, :, None, :]                                     # unsqueeze(2)


if __name__ == "__main__":
    # x: (B, C, 16, 16) -> c_in = 256; hidden c_out = 128.
    B, C, H, W = 2, 4, 16, 16
    c_in, c_out = H * W, 128

    key = jax.random.PRNGKey(0)
    kx, kp = jax.random.split(key)
    x = jax.random.normal(kx, (B, C, H, W), dtype=jnp.float32)
    w, b = init_params(kp, c_in, c_out)

    y = gauss_norm(x, w, b)
    jax.block_until_ready(y)
    assert y.shape == (B, C, 1, c_out), f"bad output shape {y.shape}"

    # Kernel streams bf16 inputs; check tightly against a reference using the
    # same bf16-cast inputs (kernel correctness) ...
    x_q = x.astype(jnp.bfloat16).astype(jnp.float32)
    w_q = w.astype(jnp.bfloat16).astype(jnp.float32)
    y_ref_q = _reference(x_q, w_q, b)
    assert jnp.allclose(y, y_ref_q, atol=1e-4, rtol=1e-4), "kernel mismatch"

    # ... and loosely against the full-f32 PyTorch-equivalent reference
    # (bf16 input-quantization error only).
    y_ref = _reference(x, w, b)
    assert jnp.allclose(y, y_ref, atol=5e-2, rtol=5e-2), "semantic mismatch"

    print("KERNEL_OK")
</pallas_src>

<mosaic_0001>
module attributes {stable_mosaic.version = 11 : i64} {
  func.func @_gauss_norm_kernel(%arg0: i32, %arg1: memref<8x256xbf16, #tpu.memory_space<vmem>>, %arg2: memref<256x128xbf16, #tpu.memory_space<vmem>>, %arg3: memref<1x128xf32, #tpu.memory_space<vmem>>, %arg4: memref<8x128xf32, #tpu.memory_space<vmem>>) attributes {dimension_semantics = [#tpu.dimension_semantics<parallel>], iteration_bounds = array<i64: 1>, scalar_prefetch = 0 : i64, scratch_operands = 0 : i64, tpu.core_type = #tpu.core_type<tc>, window_params = [{transform_indices = @transform_0, window_bounds = array<i64: 8, 256>}, {pipeline_mode = #tpu.pipeline_mode<synchronous>, transform_indices = @transform_1, window_bounds = array<i64: 256, 128>}, {pipeline_mode = #tpu.pipeline_mode<synchronous>, transform_indices = @transform_2, window_bounds = array<i64: 1, 128>}, {transform_indices = @transform_3, window_bounds = array<i64: 8, 128>}]} {
    %c0 = arith.constant 0 : index
    %c0_0 = arith.constant 0 : index
    %0 = vector.load %arg1[%c0, %c0_0] : memref<8x256xbf16, #tpu.memory_space<vmem>>, vector<8x256xbf16>
    %c0_1 = arith.constant 0 : index
    %c0_2 = arith.constant 0 : index
    %1 = vector.load %arg2[%c0_1, %c0_2] : memref<256x128xbf16, #tpu.memory_space<vmem>>, vector<256x128xbf16>
    %cst = arith.constant dense<0.000000e+00> : vector<8x128xf32>
    %2 = tpu.matmul %0, %1, %cst {dimension_numbers = #tpu.dot_dimension_numbers<[1], [0], [0], [1], [0, 0, 1, 1], [], []>} : vector<8x256xbf16>, vector<256x128xbf16>, vector<8x128xf32> -> vector<8x128xf32>
    %c0_3 = arith.constant 0 : index
    %c0_4 = arith.constant 0 : index
    %3 = vector.load %arg3[%c0_3, %c0_4] : memref<1x128xf32, #tpu.memory_space<vmem>>, vector<1x128xf32>
    %4 = vector.broadcast %3 : vector<1x128xf32> to vector<8x128xf32>
    %5 = arith.addf %2, %4 : vector<8x128xf32>
    %c0_5 = arith.constant 0 : index
    %c0_6 = arith.constant 0 : index
    %6 = vector.load %arg4[%c0_5, %c0_6] : memref<8x128xf32, #tpu.memory_space<vmem>>, vector<8x128xf32>
    tpu.vector_store %arg4[%c0_5, %c0_6], %5 {strides = array<i32>} : memref<8x128xf32, #tpu.memory_space<vmem>>, vector<8x128xf32>,
    return
  }
  func.func @transform_0(%arg0: i32) -> (i32, i32) {
    %c0_i32 = arith.constant 0 : i32
    %c0_i32_0 = arith.constant 0 : i32
    return %arg0, %c0_i32 : i32, i32
  }
  func.func @transform_1(%arg0: i32) -> (i32, i32) {
    %c0_i32 = arith.constant 0 : i32
    %c0_i32_0 = arith.constant 0 : i32
    %c0_i32_1 = arith.constant 0 : i32
    return %c0_i32, %c0_i32_0 : i32, i32
  }
  func.func @transform_2(%arg0: i32) -> (i32, i32) {
    %c0_i32 = arith.constant 0 : i32
    %c0_i32_0 = arith.constant 0 : i32
    %c0_i32_1 = arith.constant 0 : i32
    return %c0_i32, %c0_i32_0 : i32, i32
  }
  func.func @transform_3(%arg0: i32) -> (i32, i32) {
    %c0_i32 = arith.constant 0 : i32
    %c0_i32_0 = arith.constant 0 : i32
    return %arg0, %c0_i32 : i32, i32
  }
}

</mosaic_0001>

<bundles_post_ra>
// kernel: _gauss_norm_impl.1
= control target key start
LH: loop header
LB: loop body
LE: loop exit
PB: predicated region body
PF: predicated region fallthrough
CT: control target
= control target key end

     0   :  { %s385_s0 = inlined_call_operand.vmem [shape: bf16[8,256], index: 0, kind: input, shape index: {}]   ;;  %s386_s1 = inlined_call_operand.vmem [shape: bf16[256,128], index: 1, kind: input, shape index: {}]   ;;  %s387_s2 = inlined_call_operand.vmem [shape: f32[1,128], index: 2, kind: input, shape index: {}]   ;;  %s388_s3 = inlined_call_operand.hbm [shape: f32[8,128], index: 3, kind: output, shape index: {}]  }
   0x1   :  { %v256_v0 = vld [vmem:[%s386_s1 + $0x40] sm:$0xff]   ;;  %v258_v2 = vld [vmem:[%s386_s1 + $0x48] sm:$0xff]   ;;  %v260_v4 = vld [vmem:[%s386_s1 + $0x50] sm:$0xff]  }
   0x2   :  { %v257_v1 = vld [vmem:[%s386_s1] sm:$0xff]   ;;  %233 = vmatprep.subr.bf16.mxu0 %v256_v0  ;;  %v259_v3 = vld [vmem:[%s386_s1 + $0x8] sm:$0xff]   ;;  %v261_v5 = vld [vmem:[%s386_s1 + $0x10] sm:$0xff]  }
   0x3   :  { %234 = vmatpush3.bf16.msra.mxu0 %v257_v1  ;;  %v262_v6 = vld [vmem:[%s386_s1 + $0x58] sm:$0xff]   ;;  %v264_v8 = vld [vmem:[%s386_s1 + $0x60] sm:$0xff]   ;;  %v266_v10 = vld [vmem:[%s386_s1 + $0x68] sm:$0xff]  }
   0x4   :  { %235 = vmatprep.subr.bf16.mxu0 %v258_v2  ;;  %v263_v7 = vld [vmem:[%s386_s1 + $0x18] sm:$0xff]   ;;  %v265_v9 = vld [vmem:[%s386_s1 + $0x20] sm:$0xff]  }
   0x5   :  { %v16_v11 = vld [vmem:[%s385_s0] sm:$0xff] }
   0x7   :  { %236 = vmatpush3.bf16.msra.mxu0 %v259_v3 }
   0x8   :  { %237 = vmatprep.subr.bf16.mxu0 %v260_v4 }
   0xb   :  { %238 = vmatpush3.bf16.msra.mxu0 %v261_v5 }
   0xc   :  { %239 = vmatprep.subr.bf16.mxu0 %v262_v6 }
   0xf   :  { %240 = vmatpush3.bf16.msra.mxu0 %v263_v7 }
  0x10   :  { %241 = vmatprep.subr.bf16.mxu0 %v264_v8 }
  0x11   :  { %8 = vsyncpa [#allocation3], 0  ;;  %v216_v12 = vcombine.high %v16_v11, %v16_v11  ;;  %v267_v13 = vld [vmem:[%s386_s1 + $0x28] sm:$0xff]   ;;  %v268_v14 = vld [vmem:[%s386_s1 + $0x70] sm:$0xff]   ;;  %v215_v18 = vcombine.low %v16_v11, %v16_v11  ;;  %s298_s20 = smov [#allocation2]  }
  0x12   :  { %v269_v15 = vld [vmem:[%s386_s1 + $0x30] sm:$0xff]   ;;  %v270_v16 = vld [vmem:[%s386_s1 + $0x78] sm:$0xff]   ;;  %v214_v21 = vld [vmem:[%s387_s2] ss:$0 sm:$0xff]  ;;  %s206_s21 = sshll.u32 %s298_s20, 4  ;;  %s207_s21 = int_to_ptr.vmem [resolvable:$true] %s206_s21 }
  0x13   :  { %242 = vmatpush3.bf16.msra.mxu0 %v265_v9  ;;  %191 = vmatprep.mubr.bf16.mxu0 %v216_v12  ;;  %v271_v17 = vld [vmem:[%s386_s1 + $0x38] sm:$0xff]   ;;  %s274_s22 = scalar_lea.vmem %s207_s21, 128  ;;  %p279_p1 = scmp.lt.s32.totalorder %s207_s21, %s207_s21 }
  0x14   :  { %243 = vmatprep.subr.bf16.mxu0 %v266_v10  ;;  %p275_p0 = scmp.ne.s32.totalorder %s207_s21, %s274_s22  ;;  %p280_p2 = scmp.lt.s32.totalorder %s274_s22, %s274_s22 }
  0x16   :  { %p281_p3 = por %p280_p2, %p279_p1 }
  0x17   :  { %244 = vmatpush3.bf16.msra.mxu0 %v267_v13 }
  0x18   :  { %245 = vmatprep.subr.bf16.mxu0 %v268_v14  ;;  %p282_p4 = pnand %p281_p3, %p275_p0 }
  0x1b   :  { %246 = vmatpush3.bf16.msra.mxu0 %v269_v15 }
  0x1c   :  { %247 = vmatprep.subr.bf16.mxu0 %v270_v16 }
  0x1f   :  { %248 = vmatpush3.bf16.msra.mxu0 %v271_v17 }
  0x22   :  { %192 = vmatmul.mubr.bf16.vlgmr.msra.gmra.mrb[0].mxu0 %v215_v18 }
  0xf5   :  { %v249_v19 = vpop.f32.mrb[0].mxu0 }
  0xf6   :  { %v250_v20 = vpop.f32.mrb[1].mxu0 }
  0xf7   :  { %v251_v22 = vadd.f32 %v250_v20, %v249_v19  ;;  %v252_v23 = vpop.f32.mrb[2].mxu0 }
  0xf8   :  { %v253_v24 = vpop.f32.mrb[3].mxu0 }
  0xf9   :  { %v194_v25 = vadd.f32 %v251_v22, %v214_v21 }
  0xfb   :  { %199 = vst [vmem:[#allocation2] sm:$0xff] %v194_v25 }
  0xfc   :  { %285 = shalt.err (!%p282_p4)
}
  0xfd   :  { %s286_s24 = scalar_lea.hbm %s388_s3, 128 }
  0xfe   :  { %p287_p5 = scmp.ne.s32.totalorder %s388_s3, %s286_s24  ;;  %p290_p6 = scmp.lt.u32.totalorder %s286_s24, %s388_s3 }
 0x100   :  { %p292_p7 = pnand %p290_p6, %p287_p5 }
 0x102   :  { %295 = shalt.err (!%p292_p7)
}
 0x103   :  { %209 = dma.vmem_to_hbm [thread:$0]  %s207_s21, 128, %s388_s3, [#allocation3]  }
 0x104   :  { %296 = dma.done.wait [#allocation3], 128  }
 0x105   :  { %297 = vsyncadd [#allocation3], 4294967168 }
 0x106   :  { %213 = vsyncpa [#allocation3], 1 }

</bundles_post_ra>
